<compile_context>
chip_gen: v7x
topology: tpu7x:2x2x1
jax: 0.10.0
libtpu: 0.0.40
codegen_flags: <defaults>
</compile_context>

<pallas_src>
import functools

import jax
import jax.numpy as jnp
from jax import lax
from jax.experimental import pallas as pl
from jax.experimental.pallas import tpu as pltpu

_LANES = 128
_MAX_TILE_ROWS = 1024            # review: >512-1024 rows gives <2% extra roofline, risks v7x VMEM
_MIN_ROWS_FOR_SPLIT = 1024       # only force a 2-step grid when the step overhead is negligible


def _round_up(a, b):
    return (a + b - 1) // b * b


def _sublane(dtype):
    # Minimum second-to-last tile dim: 8 for f32, 16 for bf16, 32 for int8.
    return max(8, 32 // jnp.dtype(dtype).itemsize)


def _vmem_budget_bytes():
    """~Half of physical VMEM (generation aware: v5e/v6e 128 MiB, v7x 64 MiB)."""
    try:
        cap = pltpu.get_tpu_info().vmem_capacity_bytes
    except Exception:
        cap = 64 * 1024 * 1024  # conservative fallback
    return max(16 * 1024 * 1024, cap // 2)


def _choose_tile_rows(n_rows, width, itemsize, sublane, budget):
    """Largest row tile fitting the VMEM budget, counting the in-kernel f32
    working set (~4 f32 copies of the tile) on top of the double-buffered
    input/output tiles."""
    per_row = 4 * width * itemsize + 4 * width * 4
    max_tr = (budget * 3 // 4) // per_row
    max_tr = max(sublane, max_tr // sublane * sublane)
    max_tr = min(max_tr, _MAX_TILE_ROWS)
    tr = min(max_tr, _round_up(n_rows, sublane))
    # Force an even (=2) grid only for large row counts: shards the "parallel"
    # axis across v7x's 2 TCs, while the ~0.35us extra step is noise at that
    # size on the 1-TC v5e/v6e.
    if n_rows >= _MIN_ROWS_FOR_SPLIT and pl.cdiv(n_rows, tr) < 2:
        tr = max(sublane, _round_up(pl.cdiv(n_rows, 2), sublane))
    return tr


# ---------------------------------------------------------------------------
# Standalone LayerNorm
# ---------------------------------------------------------------------------
def _layernorm_kernel(x_ref, g_ref, o_ref, *, eps, stable):
    """LayerNorm over the full (lane) feature axis, one logical row per row."""
    x = x_ref[...].astype(jnp.float32)           # (tile_rows, dim)
    if stable:
        row_max = jnp.max(x, axis=-1, keepdims=True)
        x = x * pl.reciprocal(row_max, approx=True)   # EUP slot, ~free
    mean = jnp.mean(x, axis=-1, keepdims=True)
    xc = x - mean
    var = jnp.mean(xc * xc, axis=-1, keepdims=True)   # two-pass: no cancellation
    o_ref[...] = (xc * lax.rsqrt(var + eps) * g_ref[...]).astype(o_ref.dtype)


def _layernorm_kernel_packed(x_ref, g_ref, p_ref, o_ref, *, eps, stable, dim, k):
    """k logical rows packed per 128-lane row.  Segmented mean/var are done on
    the MXU via P (width x width group-averaging matrix: 1/dim within a group,
    0 elsewhere), freeing the XLU/VPU slots."""
    x = x_ref[...].astype(jnp.float32)           # (tile_rows, k*dim)
    if stable:
        group = lax.broadcasted_iota(jnp.int32, x.shape, 1) // dim
        xs = x
        for j in range(k):
            m = group == j
            gmax = jnp.max(jnp.where(m, x, -jnp.inf), axis=-1, keepdims=True)
            gmax = jnp.where(gmax == 0.0, 1.0, gmax)   # guard zero-padded rows
            xs = jnp.where(m, x * pl.reciprocal(gmax, approx=True), xs)
        x = xs
    p = p_ref[...]                               # (width, width) f32
    mean = jnp.dot(x, p, preferred_element_type=jnp.float32)        # per-group mean, broadcast
    xc = x - mean
    var = jnp.dot(xc * xc, p, preferred_element_type=jnp.float32)   # per-group var, broadcast
    o_ref[...] = (xc * lax.rsqrt(var + eps) * g_ref[...]).astype(o_ref.dtype)


def layer_norm(x, g, *, eps=1e-5, fp16_eps=1e-3, stable=False):
    """Pallas TPU LayerNorm over the last axis of x (x: (..., dim), g: (dim,))."""
    orig_shape = x.shape
    dim = orig_shape[-1]
    assert g.shape == (dim,)
    eps_val = eps if x.dtype == jnp.float32 else fp16_eps   # mirrors PyTorch module

    rows = 1
    for s in orig_shape[:-1]:
        rows *= s
    x2 = x.reshape(rows, dim)

    # Pack k logical rows per 128-lane row when the feature dim is narrower
    # than a vreg so HBM loads/stores stay lane-dense (no vst.msk).
    k = _LANES // dim if (dim < _LANES and _LANES % dim == 0) else 1
    width = k * dim

    itemsize = jnp.dtype(x.dtype).itemsize
    sub = _sublane(x.dtype)
    budget = _vmem_budget_bytes()

    if k > 1:
        # Minimal pad: only to a k*sublane multiple (needed for the packed
        # reshape), not to a full tile multiple.
        rows_pad = _round_up(rows, k * sub)
        if rows_pad != rows:
            x2 = jnp.pad(x2, ((0, rows_pad - rows), (0, 0)))
        xp = x2.reshape(rows_pad // k, width)
        n_rows = rows_pad // k
    else:
        rows_pad = rows
        xp = x2                      # no pad/slice HBM passes; ragged last block
        n_rows = rows

    tr = _choose_tile_rows(n_rows, width, itemsize, sub, budget)
    grid_rows = pl.cdiv(n_rows, tr)

    # Hoisted scale cast / broadcast (tiled k times for the packed layout).
    g2 = jnp.tile(g.astype(jnp.float32), k).reshape(1, width)

    in_specs = [
        pl.BlockSpec((tr, width), lambda i: (i, 0)),
        pl.BlockSpec((1, width), lambda i: (0, 0)),
    ]
    operands = [xp, g2]
    if k > 1:
        lane = jnp.arange(width, dtype=jnp.int32)
        p_mat = ((lane[:, None] // dim) == (lane[None, :] // dim)).astype(jnp.float32) / dim
        in_specs.append(pl.BlockSpec((width, width), lambda i: (0, 0)))
        operands.append(p_mat)
        kernel = functools.partial(_layernorm_kernel_packed, eps=eps_val,
                                   stable=stable, dim=dim, k=k)
        extra_flops = 4 * n_rows * width * width        # two (tr,w)@(w,w) matmuls
    else:
        kernel = functools.partial(_layernorm_kernel, eps=eps_val, stable=stable)
        extra_flops = 0

    cost = pl.CostEstimate(
        flops=10 * rows * dim + extra_flops,
        transcendentals=rows * (2 if stable else 1),
        bytes_accessed=2 * rows * dim * itemsize + width * 4,
    )

    out = pl.pallas_call(
        kernel,
        out_shape=jax.ShapeDtypeStruct(xp.shape, x.dtype),
        grid_spec=pltpu.PrefetchScalarGridSpec(
            num_scalar_prefetch=0,
            grid=(grid_rows,),
            in_specs=in_specs,
            out_specs=pl.BlockSpec((tr, width), lambda i: (i, 0)),
        ),
        compiler_params=pltpu.CompilerParams(
            dimension_semantics=("parallel",),
            vmem_limit_bytes=budget,
        ),
        cost_estimate=cost,
    )(*operands)

    if k > 1:
        out = out.reshape(rows_pad, dim)
        if rows_pad != rows:
            out = out[:rows]
    return out.reshape(orig_shape)


# ---------------------------------------------------------------------------
# Fused LayerNorm + Linear (bias=False)
# ---------------------------------------------------------------------------
def _layernorm_matmul_kernel(x_ref, g_ref, w_ref, o_ref, xn_ref, *, eps, stable):
    # LayerNorm once per row tile (j == 0); the normalized tile is kept in a
    # VMEM scratch (in the matmul input dtype) and reused for every j.
    @pl.when(pl.program_id(1) == 0)
    def _():
        x = x_ref[...].astype(jnp.float32)       # (tm, dim)
        if stable:
            row_max = jnp.max(x, axis=-1, keepdims=True)
            x = x * pl.reciprocal(row_max, approx=True)
        mean = jnp.mean(x, axis=-1, keepdims=True)
        xc = x - mean
        var = jnp.mean(xc * xc, axis=-1, keepdims=True)
        xn_ref[...] = (xc * lax.rsqrt(var + eps) * g_ref[...]).astype(xn_ref.dtype)

    # Native-dtype MXU operands (bf16 x bf16 -> f32 acc when inputs are bf16;
    # f32 path only for f32 inputs).
    o_ref[...] = jnp.dot(xn_ref[...], w_ref[...],
                         preferred_element_type=jnp.float32).astype(o_ref.dtype)


def layer_norm_linear(x, g, w, *, eps=1e-5, fp16_eps=1e-3, stable=False):
    """Fused LayerNorm(dim) -> Linear(dim, out_dim, bias=False): LN(x) @ w.

    `w` uses (in_dim, out_dim) layout, i.e. the transpose of PyTorch's
    `linear.weight`.  The normalized activations never round-trip to HBM.
    """
    orig_shape = x.shape
    dim = orig_shape[-1]
    out_dim = w.shape[1]
    assert g.shape == (dim,) and w.shape[0] == dim
    eps_val = eps if x.dtype == jnp.float32 else fp16_eps

    rows = 1
    for s in orig_shape[:-1]:
        rows *= s
    x2 = x.reshape(rows, dim)
    w2 = w.astype(x.dtype)                       # hoisted cast: native-dtype MXU operands
    g2 = g.astype(jnp.float32).reshape(1, dim)   # hoisted cast / broadcast

    itemsize = jnp.dtype(x.dtype).itemsize
    sub = _sublane(x.dtype)
    budget = _vmem_budget_bytes()

    # Keep the whole weight resident when it fits: w fetched from HBM once,
    # one LN per row tile, lane-dense output slab, grid = (nm, 1).
    w_bytes_2buf = 2 * dim * out_dim * itemsize
    if w_bytes_2buf <= budget // 2:
        tn = out_dim
    elif out_dim >= 512:
        tn = 512
    elif out_dim >= 256:
        tn = 256
    else:
        tn = 128                                  # 384 avoided: half-idle 256-wide MXU pass
    nj = pl.cdiv(out_dim, tn)

    # Row tile from the VMEM budget: double-buffered x/out tiles, the xn
    # scratch, and the in-kernel f32 temporaries.
    avail = budget * 3 // 4 - 2 * dim * tn * itemsize
    per_row = (3 * dim + 2 * tn) * itemsize + (4 * dim + tn) * 4
    avail = max(avail, per_row * sub)
    tm = min(avail // per_row, _MAX_TILE_ROWS)
    tm = max(sub, tm // sub * sub)
    tm = min(tm, _round_up(rows, sub))
    if rows >= _MIN_ROWS_FOR_SPLIT and pl.cdiv(rows, tm) < 2:
        tm = max(sub, _round_up(pl.cdiv(rows, 2), sub))
    nm = pl.cdiv(rows, tm)                        # ragged last block: no wrapper pad/slice

    kernel = functools.partial(_layernorm_matmul_kernel, eps=eps_val, stable=stable)
    cost = pl.CostEstimate(
        flops=2 * rows * dim * out_dim + 10 * rows * dim,
        transcendentals=rows * (2 if stable else 1),
        bytes_accessed=(rows * dim + dim * out_dim + rows * out_dim) * itemsize,
    )

    out = pl.pallas_call(
        kernel,
        out_shape=jax.ShapeDtypeStruct((rows, out_dim), x.dtype),
        grid_spec=pltpu.PrefetchScalarGridSpec(
            num_scalar_prefetch=0,
            grid=(nm, nj),
            in_specs=[
                pl.BlockSpec((tm, dim), lambda i, j: (i, 0)),
                pl.BlockSpec((1, dim), lambda i, j: (0, 0)),
                pl.BlockSpec((dim, tn), lambda i, j: (0, j)),
            ],
            out_specs=pl.BlockSpec((tm, tn), lambda i, j: (i, j)),
            scratch_shapes=[pltpu.VMEM((tm, dim), x.dtype)],
        ),
        compiler_params=pltpu.CompilerParams(
            # j carries the cached LN tile in scratch -> "arbitrary"; rows are
            # independent -> "parallel" (v7x megacore).
            dimension_semantics=("parallel", "arbitrary"),
            vmem_limit_bytes=budget,
        ),
        cost_estimate=cost,
    )(x2, g2, w2)

    return out.reshape(*orig_shape[:-1], out_dim)


# ---------------------------------------------------------------------------
# Pure-JAX reference (matches the PyTorch forward)
# ---------------------------------------------------------------------------
def layer_norm_ref(x, g, *, eps=1e-5, fp16_eps=1e-3, stable=False):
    eps_val = eps if x.dtype == jnp.float32 else fp16_eps
    xf = x.astype(jnp.float32)
    if stable:
        xf = xf / jnp.max(xf, axis=-1, keepdims=True)
    mean = jnp.mean(xf, axis=-1, keepdims=True)
    var = jnp.mean(jnp.square(xf - mean), axis=-1, keepdims=True)
    return ((xf - mean) * lax.rsqrt(var + eps_val) * g.astype(jnp.float32)).astype(x.dtype)


if __name__ == "__main__":
    key = jax.random.PRNGKey(0)
    k1, k2, k3, k4, k5 = jax.random.split(key, 5)

    # Shapes consistent with the DenoiseTransformer token stream:
    # batch=2, num_keypoints=8 -> tokens = time(1)+cond(8)+noisy(8)+query(8) = 25, dim=32.
    batch, seq, dim = 2, 25, 32
    x = jax.random.normal(k1, (batch, seq, dim), dtype=jnp.float32)
    g = jnp.ones((dim,), dtype=jnp.float32)   # nn.Parameter(torch.ones(dim))

    # 1) standalone LayerNorm (packed lane-dense path, dim=32 < 128; odd row count)
    out = jax.block_until_ready(layer_norm(x, g))
    ref = layer_norm_ref(x, g)
    assert out.shape == x.shape and out.dtype == x.dtype
    assert jnp.allclose(out, ref, atol=1e-4, rtol=1e-4), "layer_norm mismatch"

    # 2) stable LayerNorm (CausalTransformer output norm uses stable=True)
    out_s = jax.block_until_ready(layer_norm(x, g, stable=True))
    ref_s = layer_norm_ref(x, g, stable=True)
    assert jnp.allclose(out_s, ref_s, atol=1e-4, rtol=1e-4), "stable layer_norm mismatch"

    # 3) wide-dim LayerNorm, row count not sublane aligned (unpacked path,
    #    ragged last block handled without any wrapper pad/slice)
    xw = jax.random.normal(k2, (2, 9, 256), dtype=jnp.float32)
    gw = jnp.ones((256,), dtype=jnp.float32)
    out_w = jax.block_until_ready(layer_norm(xw, gw))
    assert jnp.allclose(out_w, layer_norm_ref(xw, gw), atol=1e-4, rtol=1e-4), \
        "wide layer_norm mismatch"

    # 4) fused LayerNorm + Linear(bias=False), e.g. Attention.to_kv: dim -> 2*dim_head
    w = jax.random.normal(k3, (dim, 64), dtype=jnp.float32) / jnp.sqrt(dim)
    out_f = jax.block_until_ready(layer_norm_linear(x, g, w))
    ref_f = jnp.dot(layer_norm_ref(x, g).reshape(-1, dim), w,
                    precision=jax.lax.Precision.HIGHEST).reshape(batch, seq, 64)
    assert out_f.shape == (batch, seq, 64) and out_f.dtype == x.dtype
    # MXU f32 pass decomposition may differ slightly from the HIGHEST-precision
    # XLA reference matmul.
    assert jnp.allclose(out_f, ref_f, atol=3e-2, rtol=3e-2), "fused LN+Linear mismatch"

    # 5) fused LN + Linear with bf16 inputs (native bf16 MXU path, f32 accumulation)
    xb = jax.random.normal(k4, (batch, seq, dim), dtype=jnp.float32).astype(jnp.bfloat16)
    wb = (jax.random.normal(k5, (dim, 128), dtype=jnp.float32) / jnp.sqrt(dim)).astype(jnp.bfloat16)
    out_b = jax.block_until_ready(layer_norm_linear(xb, g, wb))
    ref_b = jnp.dot(layer_norm_ref(xb, g).astype(jnp.float32).reshape(-1, dim),
                    wb.astype(jnp.float32),
                    precision=jax.lax.Precision.HIGHEST).reshape(batch, seq, 128)
    assert out_b.shape == (batch, seq, 128) and out_b.dtype == jnp.bfloat16
    assert jnp.allclose(out_b.astype(jnp.float32), ref_b, atol=5e-2, rtol=5e-2), \
        "bf16 fused LN+Linear mismatch"

    print("KERNEL_OK")
</pallas_src>

<mosaic_0001>
module attributes {stable_mosaic.version = 11 : i64} {
  func.func @_layernorm_kernel_packed(%arg0: i32, %arg1: memref<16x128xf32, #tpu.memory_space<vmem>>, %arg2: memref<1x128xf32, #tpu.memory_space<vmem>>, %arg3: memref<128x128xf32, #tpu.memory_space<vmem>>, %arg4: memref<16x128xf32, #tpu.memory_space<vmem>>) attributes {dimension_semantics = [#tpu.dimension_semantics<parallel>], iteration_bounds = array<i64: 1>, scalar_prefetch = 0 : i64, scratch_operands = 0 : i64, tpu.core_type = #tpu.core_type<tc>, window_params = [{transform_indices = @transform_0, window_bounds = array<i64: 16, 128>}, {pipeline_mode = #tpu.pipeline_mode<synchronous>, transform_indices = @transform_1, window_bounds = array<i64: 1, 128>}, {pipeline_mode = #tpu.pipeline_mode<synchronous>, transform_indices = @transform_2, window_bounds = array<i64: 128, 128>}, {transform_indices = @transform_3, window_bounds = array<i64: 16, 128>}]} {
    %c0 = arith.constant 0 : index
    %c0_0 = arith.constant 0 : index
    %0 = vector.load %arg1[%c0, %c0_0] : memref<16x128xf32, #tpu.memory_space<vmem>>, vector<16x128xf32>
    %c0_1 = arith.constant 0 : index
    %c0_2 = arith.constant 0 : index
    %1 = vector.load %arg3[%c0_1, %c0_2] : memref<128x128xf32, #tpu.memory_space<vmem>>, vector<128x128xf32>
    %cst = arith.constant dense<0.000000e+00> : vector<16x128xf32>
    %2 = tpu.matmul %0, %1, %cst {dimension_numbers = #tpu.dot_dimension_numbers<[1], [0], [0], [1], [0, 0, 1, 1], [], []>} : vector<16x128xf32>, vector<128x128xf32>, vector<16x128xf32> -> vector<16x128xf32>
    %3 = arith.subf %0, %2 : vector<16x128xf32>
    %4 = arith.mulf %3, %3 : vector<16x128xf32>
    %cst_3 = arith.constant dense<0.000000e+00> : vector<16x128xf32>
    %5 = tpu.matmul %4, %1, %cst_3 {dimension_numbers = #tpu.dot_dimension_numbers<[1], [0], [0], [1], [0, 0, 1, 1], [], []>} : vector<16x128xf32>, vector<128x128xf32>, vector<16x128xf32> -> vector<16x128xf32>
    %cst_4 = arith.constant 9.99999974E-6 : f32
    %6 = vector.broadcast %cst_4 : f32 to vector<16x128xf32>
    %7 = arith.addf %5, %6 : vector<16x128xf32>
    %8 = math.rsqrt %7 : vector<16x128xf32>
    %9 = arith.mulf %3, %8 : vector<16x128xf32>
    %c0_5 = arith.constant 0 : index
    %c0_6 = arith.constant 0 : index
    %10 = vector.load %arg2[%c0_5, %c0_6] : memref<1x128xf32, #tpu.memory_space<vmem>>, vector<1x128xf32>
    %11 = vector.broadcast %10 : vector<1x128xf32> to vector<16x128xf32>
    %12 = arith.mulf %9, %11 : vector<16x128xf32>
    %c0_7 = arith.constant 0 : index
    %c0_8 = arith.constant 0 : index
    %13 = vector.load %arg4[%c0_7, %c0_8] : memref<16x128xf32, #tpu.memory_space<vmem>>, vector<16x128xf32>
    tpu.vector_store %arg4[%c0_7, %c0_8], %12 {strides = array<i32>} : memref<16x128xf32, #tpu.memory_space<vmem>>, vector<16x128xf32>,
    return
  }
  func.func @transform_0(%arg0: i32) -> (i32, i32) {
    %c0_i32 = arith.constant 0 : i32
    %c0_i32_0 = arith.constant 0 : i32
    return %arg0, %c0_i32 : i32, i32
  }
  func.func @transform_1(%arg0: i32) -> (i32, i32) {
    %c0_i32 = arith.constant 0 : i32
    %c0_i32_0 = arith.constant 0 : i32
    %c0_i32_1 = arith.constant 0 : i32
    return %c0_i32, %c0_i32_0 : i32, i32
  }
  func.func @transform_2(%arg0: i32) -> (i32, i32) {
    %c0_i32 = arith.constant 0 : i32
    %c0_i32_0 = arith.constant 0 : i32
    %c0_i32_1 = arith.constant 0 : i32
    return %c0_i32, %c0_i32_0 : i32, i32
  }
  func.func @transform_3(%arg0: i32) -> (i32, i32) {
    %c0_i32 = arith.constant 0 : i32
    %c0_i32_0 = arith.constant 0 : i32
    return %arg0, %c0_i32 : i32, i32
  }
}

</mosaic_0001>

<bundles_post_ra>
// kernel: tpu_custom_call.1
= control target key start
LH: loop header
LB: loop body
LE: loop exit
PB: predicated region body
PF: predicated region fallthrough
CT: control target
= control target key end

     0   :  { %8 = vsyncpa [#allocation3], 0  ;;  %s573_s0 = inlined_call_operand.hbm [shape: f32[16,128], index: 0, kind: input, shape index: {}]   ;;  %s574_s1 = inlined_call_operand.vmem [shape: f32[1,128], index: 1, kind: input, shape index: {}]   ;;  %s575_s2 = inlined_call_operand.hbm [shape: f32[128,128], index: 2, kind: input, shape index: {}]   ;;  %s576_s3 = inlined_call_operand.hbm [shape: f32[16,128], index: 3, kind: output, shape index: {}]  }
   0x1   :  { %9 = vsyncpa [#allocation6], 0 }
   0x2   :  { %10 = vsyncpa [#allocation4], 0  ;;  %s500_s12 = smov [#allocation2]   ;;  %s428_s16 = scalar_lea.hbm %s573_s0, 256 }
   0x3   :  { %s16_s13 = sshll.u32 %s500_s12, 4  ;;  %p429_p0 = scmp.ne.s32.totalorder %s573_s0, %s428_s16  ;;  %s17_s13 = int_to_ptr.vmem [resolvable:$true] %s16_s13 }
   0x4   :  { %p432_p1 = scmp.lt.u32.totalorder %s428_s16, %s573_s0 }
   0x6   :  { %p434_p2 = pnand %p432_p1, %p429_p0 }
   0x8   :  { %437 = shalt.err (!%p434_p2)
}
   0x9   :  { %s438_s21 = scalar_lea.vmem %s17_s13, 256  ;;  %p443_p4 = scmp.lt.s32.totalorder %s17_s13, %s17_s13 }
   0xa   :  { %p439_p3 = scmp.ne.s32.totalorder %s17_s13, %s438_s21  ;;  %p444_p5 = scmp.lt.s32.totalorder %s438_s21, %s438_s21 }
   0xc   :  { %p445_p6 = por %p444_p5, %p443_p4 }
   0xe   :  { %p446_p7 = pnand %p445_p6, %p439_p3 }
  0x10   :  { %449 = shalt.err (!%p446_p7)
}
  0x11   :  { %s501_s22 = smov 128   ;;  %s502_s23 = smov 8  }
  0x12   :  { %22 = dma.hbm_to_vmem [thread:$0]  %s573_s0, 256, %s17_s13, [#allocation3], %s501_s22, %s501_s22, %s502_s23  }
  0x13   :  { %s503_s26 = smov [#allocation5]   ;;  %s450_s30 = scalar_lea.hbm %s575_s2, 2048 }
  0x14   :  { %s30_s27 = sshll.u32 %s503_s26, 4  ;;  %p451_p8 = scmp.ne.s32.totalorder %s575_s2, %s450_s30  ;;  %s31_s27 = int_to_ptr.vmem [resolvable:$true] %s30_s27 }
  0x15   :  { %p454_p9 = scmp.lt.u32.totalorder %s450_s30, %s575_s2 }
  0x17   :  { %p456_p10 = pnand %p454_p9, %p451_p8 }
  0x19   :  { %459 = shalt.err (!%p456_p10)
}
  0x1a   :  { %s460_s8 = scalar_lea.vmem %s31_s27, 2048  ;;  %p465_p12 = scmp.lt.s32.totalorder %s31_s27, %s31_s27 }
  0x1b   :  { %p461_p11 = scmp.ne.s32.totalorder %s31_s27, %s460_s8  ;;  %p466_p13 = scmp.lt.s32.totalorder %s460_s8, %s460_s8 }
  0x1d   :  { %p467_p0 = por %p466_p13, %p465_p12 }
  0x1f   :  { %p468_p1 = pnand %p467_p0, %p461_p11 }
  0x21   :  { %471 = shalt.err (!%p468_p1)
}
  0x22   :  { %36 = dma.hbm_to_vmem [thread:$0]  %s575_s2, 2048, %s31_s27, [#allocation6], %s501_s22, %s501_s22, %s502_s23  }
  0x23   :  { %494 = dma.done.wait [#allocation3], 256  }
  0x24   :  { %495 = vsyncadd [#allocation3], 4294967040 }
  0x25   :  { %496 = dma.done.wait [#allocation6], 2048  }
  0x26   :  { %497 = vsyncadd [#allocation6], 4294965248  ;;  %v45_v0 = vld [vmem:[#allocation5] sm:$0xff]  ;;  %v46_v1 = vld [vmem:[#allocation5 + $0x8] sm:$0xff]  ;;  %s504_s11 = smov [#allocation7]  }
  0x27   :  { %v47_v2 = vld [vmem:[#allocation5 + $0x10] sm:$0xff]  ;;  %v355_v3 = vpack.c.bf16 %v46_v1, %v45_v0  ;;  %v48_v4 = vld [vmem:[#allocation5 + $0x18] sm:$0xff]  ;;  %v49_v6 = vld [vmem:[#allocation5 + $0x20] sm:$0xff]  ;;  %s235_s12 = sshll.u32 %s504_s11, 4  ;;  %s236_s12 = int_to_ptr.vmem [resolvable:$true] %s235_s12 }
  0x28   :  { %v359_v5 = vpack.c.bf16 %v48_v4, %v47_v2  ;;  %v50_v7 = vld [vmem:[#allocation5 + $0x28] sm:$0xff]  ;;  %v43_v9 = vld [vmem:[#allocation2] sm:$0xff]  ;;  %v52_v11 = vld [vmem:[#allocation5 + $0x38] sm:$0xff]  ;;  %s472_s13 = scalar_lea.vmem %s236_s12, 256  ;;  %p477_p3 = scmp.lt.s32.totalorder %s236_s12, %s236_s12 }
  0x29   :  { %356 = vmatprep.subr.bf16.mxu0 %v355_v3  ;;  %388 = vmatprep.subr.bf16.mxu1 %v355_v3  ;;  %v363_v8 = vpack.c.bf16 %v50_v7, %v49_v6  ;;  %v51_v10 = vld [vmem:[#allocation5 + $0x30] sm:$0xff]  ;;  %v53_v13 = vld [vmem:[#allocation5 + $0x40] sm:$0xff]  ;;  %v54_v14 = vld [vmem:[#allocation5 + $0x48] sm:$0xff]  ;;  %p473_p2 = scmp.ne.s32.totalorder %s236_s12, %s472_s13  ;;  %p478_p4 = scmp.lt.s32.totalorder %s472_s13, %s472_s13 }
  0x2a   :  { %358 = vmatpush3.bf16.msra.mxu0 %v355_v3  ;;  %390 = vmatpush3.bf16.msra.mxu1 %v355_v3  ;;  %v367_v12 = vpack.c.bf16 %v52_v11, %v51_v10  ;;  %v371_v15 = vpack.c.bf16 %v54_v14, %v53_v13  ;;  %v55_v16 = vld [vmem:[#allocation5 + $0x50] sm:$0xff]  ;;  %v56_v17 = vld [vmem:[#allocation5 + $0x58] sm:$0xff]  ;;  %v57_v19 = vld [vmem:[#allocation5 + $0x60] sm:$0xff] }
  0x2b   :  { %360 = vmatprep.subr.bf16.mxu0 %v359_v5  ;;  %392 = vmatprep.subr.bf16.mxu1 %v359_v5  ;;  %v375_v18 = vpack.c.bf16 %v56_v17, %v55_v16  ;;  %v58_v20 = vld [vmem:[#allocation5 + $0x68] sm:$0xff]  ;;  %v59_v22 = vld [vmem:[#allocation5 + $0x70] sm:$0xff]  ;;  %v60_v23 = vld [vmem:[#allocation5 + $0x78] sm:$0xff]  ;;  %p479_p5 = por %p478_p4, %p477_p3 }
  0x2c   :  { %317 = vmatprep.mubr.f32.mxu0 %v43_v9  ;;  %v379_v21 = vpack.c.bf16 %v58_v20, %v57_v19  ;;  %v383_v24 = vpack.c.bf16 %v60_v23, %v59_v22  ;;  %v44_v25 = vld [vmem:[#allocation2 + $0x8] sm:$0xff]  ;;  %v248_v37 = vld [vmem:[%s574_s1] ss:$0 sm:$0xff] }
  0x2d   :  { %p480_p6 = pnand %p479_p5, %p473_p2 }
  0x2e   :  { %362 = vmatpush3.bf16.msra.mxu0 %v359_v5  ;;  %394 = vmatpush3.bf16.msra.mxu1 %v359_v5 }
  0x2f   :  { %364 = vmatprep.subr.bf16.mxu0 %v363_v8  ;;  %396 = vmatprep.subr.bf16.mxu1 %v363_v8 }
  0x32   :  { %366 = vmatpush3.bf16.msra.mxu0 %v363_v8  ;;  %398 = vmatpush3.bf16.msra.mxu1 %v363_v8 }
  0x33   :  { %368 = vmatprep.subr.bf16.mxu0 %v367_v12  ;;  %400 = vmatprep.subr.bf16.mxu1 %v367_v12 }
  0x36   :  { %370 = vmatpush3.bf16.msra.mxu0 %v367_v12  ;;  %402 = vmatpush3.bf16.msra.mxu1 %v367_v12 }
  0x37   :  { %372 = vmatprep.subr.bf16.mxu0 %v371_v15  ;;  %404 = vmatprep.subr.bf16.mxu1 %v371_v15 }
  0x3a   :  { %374 = vmatpush3.bf16.msra.mxu0 %v371_v15  ;;  %406 = vmatpush3.bf16.msra.mxu1 %v371_v15 }
  0x3b   :  { %376 = vmatprep.subr.bf16.mxu0 %v375_v18  ;;  %408 = vmatprep.subr.bf16.mxu1 %v375_v18 }
  0x3e   :  { %378 = vmatpush3.bf16.msra.mxu0 %v375_v18  ;;  %410 = vmatpush3.bf16.msra.mxu1 %v375_v18 }
  0x3f   :  { %380 = vmatprep.subr.bf16.mxu0 %v379_v21  ;;  %412 = vmatprep.subr.bf16.mxu1 %v379_v21 }
  0x42   :  { %382 = vmatpush3.bf16.msra.mxu0 %v379_v21  ;;  %414 = vmatpush3.bf16.msra.mxu1 %v379_v21 }
  0x43   :  { %384 = vmatprep.subr.bf16.mxu0 %v383_v24  ;;  %416 = vmatprep.subr.bf16.mxu1 %v383_v24 }
  0x46   :  { %386 = vmatpush3.bf16.msra.mxu0 %v383_v24  ;;  %418 = vmatpush3.bf16.msra.mxu1 %v383_v24 }
  0x49   :  { %318 = vmatmul.mubr.f32.vlgmr.msra.gmra.mrb[0].mxu0 %v44_v25 }
 0x11c   :  { %v319_v26 = vpop.f32.mrb[0].mxu0 }
 0x11d   :  { %v137_v27 = vsub.f32 %v44_v25, %v319_v26  ;;  %v127_v28 = vpop.f32.mrb[1].mxu0 }
 0x11e   :  { %v136_v29 = vsub.f32 %v43_v9, %v127_v28 }
 0x11f   :  { %v139_v31 = vmul.f32 %v137_v27, %v137_v27 }
 0x120   :  { %v138_v30 = vmul.f32 %v136_v29, %v136_v29 }
 0x122   :  { %352 = vmatprep.mubr.f32.mxu1 %v138_v30 }
 0x123   :  { %353 = vmatmul.mubr.f32.vlgmr.msra.gmra.mrb[0].mxu1 %v139_v31 }
 0x1f6   :  { %v354_v32 = vpop.f32.mrb[0].mxu1 }
 0x1f7   :  { %v212_v33 = vadd.f32 1e-05, %v354_v32  ;;  %v206_v34 = vpop.f32.mrb[1].mxu1 }
 0x1f8   :  { %v207_v35 = vadd.f32 1e-05, %v206_v34 }
 0x1f9   :  { %424 = vrsqrt.f32 %v212_v33 }
 0x1fa   :  { %426 = vrsqrt.f32 %v207_v35 }
 0x203   :  { %v425_v36 = vpop.eup %424 }
 0x204   :  { %v427_v38 = vpop.eup %426  ;;  %v218_v39 = vmul.f32 %v425_v36, %v137_v27 }
 0x205   :  { %v217_v40 = vmul.f32 %v427_v38, %v136_v29 }
 0x206   :  { %v227_v41 = vmul.f32 %v248_v37, %v218_v39 }
 0x207   :  { %v226_v42 = vmul.f32 %v248_v37, %v217_v40 }
 0x208   :  { %229 = vst [vmem:[#allocation7 + $0x8] sm:$0xff] %v227_v41 }
 0x209   :  { %228 = vst [vmem:[#allocation7] sm:$0xff] %v226_v42 }
 0x20a   :  { %483 = shalt.err (!%p480_p6)
}
 0x20b   :  { %s484_s1 = scalar_lea.hbm %s576_s3, 256 }
 0x20c   :  { %p485_p7 = scmp.ne.s32.totalorder %s576_s3, %s484_s1  ;;  %p488_p8 = scmp.lt.u32.totalorder %s484_s1, %s576_s3 }
 0x20e   :  { %p490_p9 = pnand %p488_p8, %p485_p7 }
 0x210   :  { %493 = shalt.err (!%p490_p9)
}
 0x211   :  { %241 = dma.vmem_to_hbm [thread:$0]  %s236_s12, 256, %s576_s3, [#allocation4], %s501_s22, %s501_s22, %s502_s23  }
 0x212   :  { %498 = dma.done.wait [#allocation4], 256  }
 0x213   :  { %499 = vsyncadd [#allocation4], 4294967040 }
 0x214   :  { %245 = vsyncpa [#allocation3], 1 }
 0x215   :  { %246 = vsyncpa [#allocation6], 1 }
 0x216   :  { %247 = vsyncpa [#allocation4], 1 }

</bundles_post_ra>
